<compile_context>
chip_gen: v7x
topology: tpu7x:2x2x1
jax: 0.10.0
libtpu: 0.0.40
codegen_flags: <defaults>
</compile_context>

<pallas_src>
import functools

import jax
import jax.numpy as jnp
from jax import lax
from jax.experimental import pallas as pl
from jax.experimental.pallas import tpu as pltpu


def _l2_sim_kernel(xi_ref, xj_ref, o_ref):
    # xi_ref: (TM, D) row tile, xj_ref: (TN, D) column tile.
    xi = xi_ref[...]
    xj = xj_ref[...]
    # MXU matmul contracting the feature dim of both operands (no transpose).
    dot = lax.dot_general(
        xi, xj,
        dimension_numbers=(((1,), (1,)), ((), ())),
        preferred_element_type=jnp.float32,
    )  # (TM, TN)
    xi32 = xi.astype(jnp.float32)
    xj32 = xj.astype(jnp.float32)
    ni = jnp.sum(xi32 * xi32, axis=-1, keepdims=True)   # (TM, 1)
    nj = jnp.sum(xj32 * xj32, axis=-1)                  # (TN,)
    d2 = ni + nj[None, :] - 2.0 * dot                   # (TM, TN)
    d2 = jnp.maximum(d2, 0.0)                           # clamp rounding negatives
    o_ref[...] = (-jnp.sqrt(d2)).astype(o_ref.dtype)


def _cos_sim_kernel(xi_ref, xj_ref, o_ref):
    xi = xi_ref[...]
    xj = xj_ref[...]
    dot = lax.dot_general(
        xi, xj,
        dimension_numbers=(((1,), (1,)), ((), ())),
        preferred_element_type=jnp.float32,
    )  # (TM, TN)
    xi32 = xi.astype(jnp.float32)
    xj32 = xj.astype(jnp.float32)
    ni = jnp.sqrt(jnp.sum(xi32 * xi32, axis=-1, keepdims=True))   # (TM, 1)
    nj = jnp.sqrt(jnp.sum(xj32 * xj32, axis=-1))                  # (TN,)
    denom = jnp.maximum(ni * nj[None, :], 1e-8)                   # torch CosineSimilarity eps
    o_ref[...] = (dot * pl.reciprocal(denom)).astype(o_ref.dtype)


def _round_up(x, m):
    return (x + m - 1) // m * m


@functools.partial(jax.jit, static_argnames=("similarity_type",))
def feature_similarity(features, similarity_type="l2"):
    """Pairwise feature similarity, equivalent to FeatureSimilarity.forward."""
    N, D = features.shape

    if similarity_type == "l2":
        kernel = _l2_sim_kernel
    elif similarity_type == "cos":
        kernel = _cos_sim_kernel
    else:
        raise ValueError(similarity_type)

    # 256-aligned tiles feed full MXU passes on v6e/v7x (and are 2x128 granules
    # on v5e); fall back to 128 for small N. Pad N so both grid axes divide.
    tile = 256 if N > 128 else 128
    n_pad = _round_up(N, tile)
    tm = tn = tile

    if n_pad != N:
        features_p = jnp.pad(features, ((0, n_pad - N), (0, 0)))
    else:
        features_p = features

    itemsize = jnp.dtype(features.dtype).itemsize
    # Double-buffered inputs + double-buffered output tile; leave headroom and
    # stay well under v7x's 64 MiB physical VMEM.
    est_bytes = 2 * (tm * D + tn * D) * itemsize + 2 * tm * tn * itemsize
    vmem_limit = int(min(max(2 * est_bytes, 32 * 1024 * 1024), 60 * 1024 * 1024))

    out = pl.pallas_call(
        kernel,
        out_shape=jax.ShapeDtypeStruct((n_pad, n_pad), features.dtype),
        grid=(n_pad // tm, n_pad // tn),
        in_specs=[
            pl.BlockSpec((tm, D), lambda i, j: (i, 0)),   # row tile
            pl.BlockSpec((tn, D), lambda i, j: (j, 0)),   # column tile
        ],
        out_specs=pl.BlockSpec((tm, tn), lambda i, j: (i, j)),
        compiler_params=pltpu.CompilerParams(
            dimension_semantics=("parallel", "parallel"),
            vmem_limit_bytes=vmem_limit,
        ),
    )(features_p, features_p)

    if n_pad != N:
        out = out[:N, :N]
    return out


def _reference(features, similarity_type="l2"):
    if similarity_type == "l2":
        diff = features[:, None, :] - features[None, :, :]
        return -jnp.linalg.norm(diff, ord=2, axis=-1)
    dot = features @ features.T
    n = jnp.linalg.norm(features, axis=-1, keepdims=True)
    return dot / jnp.maximum(n * n.T, 1e-8)


if __name__ == "__main__":
    key = jax.random.PRNGKey(0)
    N, D = 8, 32                      # seq=8, hidden=32
    features = jax.random.normal(key, (N, D), dtype=jnp.float32)

    out_l2 = jax.block_until_ready(feature_similarity(features, "l2"))
    out_cos = jax.block_until_ready(feature_similarity(features, "cos"))

    ref_l2 = _reference(features, "l2")
    ref_cos = _reference(features, "cos")

    assert out_l2.shape == (N, N) and out_cos.shape == (N, N)
    assert jnp.allclose(out_l2, ref_l2, atol=1e-4, rtol=1e-4), "l2 mismatch"
    assert jnp.allclose(out_cos, ref_cos, atol=1e-4, rtol=1e-4), "cos mismatch"

    print("KERNEL_OK")
</pallas_src>

<mosaic_0001>
module attributes {stable_mosaic.version = 11 : i64} {
  func.func @_l2_sim_kernel(%arg0: i32, %arg1: i32, %arg2: memref<128x32xf32, #tpu.memory_space<vmem>>, %arg3: memref<128x32xf32, #tpu.memory_space<vmem>>, %arg4: memref<128x128xf32, #tpu.memory_space<vmem>>) attributes {dimension_semantics = [#tpu.dimension_semantics<parallel>, #tpu.dimension_semantics<parallel>], iteration_bounds = array<i64: 1, 1>, scalar_prefetch = 0 : i64, scratch_operands = 0 : i64, tpu.core_type = #tpu.core_type<tc>, window_params = [{transform_indices = @transform_0, window_bounds = array<i64: 128, 32>}, {transform_indices = @transform_1, window_bounds = array<i64: 128, 32>}, {transform_indices = @transform_2, window_bounds = array<i64: 128, 128>}]} {
    %c0 = arith.constant 0 : index
    %c0_0 = arith.constant 0 : index
    %0 = vector.load %arg2[%c0, %c0_0] : memref<128x32xf32, #tpu.memory_space<vmem>>, vector<128x32xf32>
    %c0_1 = arith.constant 0 : index
    %c0_2 = arith.constant 0 : index
    %1 = vector.load %arg3[%c0_1, %c0_2] : memref<128x32xf32, #tpu.memory_space<vmem>>, vector<128x32xf32>
    %cst = arith.constant dense<0.000000e+00> : vector<128x128xf32>
    %2 = tpu.matmul %0, %1, %cst {dimension_numbers = #tpu.dot_dimension_numbers<[1], [1], [0], [0], [0, 0, 1, 0], [], []>} : vector<128x32xf32>, vector<128x32xf32>, vector<128x128xf32> -> vector<128x128xf32>
    %3 = arith.mulf %0, %0 : vector<128x32xf32>
    %cst_3 = arith.constant dense<0.000000e+00> : vector<128xf32>
    %4 = vector.multi_reduction <add>, %3, %cst_3 [1] : vector<128x32xf32> to vector<128xf32>
    %5 = vector.shape_cast %4 : vector<128xf32> to vector<128x1xf32>
    %6 = arith.mulf %1, %1 : vector<128x32xf32>
    %cst_4 = arith.constant dense<0.000000e+00> : vector<128xf32>
    %7 = vector.multi_reduction <add>, %6, %cst_4 [1] : vector<128x32xf32> to vector<128xf32>
    %8 = vector.shape_cast %7 : vector<128xf32> to vector<1x128xf32>
    %9 = vector.broadcast %5 : vector<128x1xf32> to vector<128x128xf32>
    %10 = vector.broadcast %8 : vector<1x128xf32> to vector<128x128xf32>
    %11 = arith.addf %9, %10 : vector<128x128xf32>
    %cst_5 = arith.constant 2.000000e+00 : f32
    %12 = vector.broadcast %cst_5 : f32 to vector<128x128xf32>
    %13 = arith.mulf %12, %2 : vector<128x128xf32>
    %14 = arith.subf %11, %13 : vector<128x128xf32>
    %cst_6 = arith.constant 0.000000e+00 : f32
    %15 = vector.broadcast %cst_6 : f32 to vector<128x128xf32>
    %16 = arith.maximumf %14, %15 : vector<128x128xf32>
    %17 = math.sqrt %16 : vector<128x128xf32>
    %cst_7 = arith.constant 0.000000e+00 : f32
    %18 = vector.broadcast %cst_7 : f32 to vector<128x128xf32>
    %19 = arith.subf %18, %17 : vector<128x128xf32>
    %c0_8 = arith.constant 0 : index
    %c0_9 = arith.constant 0 : index
    %20 = vector.load %arg4[%c0_8, %c0_9] : memref<128x128xf32, #tpu.memory_space<vmem>>, vector<128x128xf32>
    tpu.vector_store %arg4[%c0_8, %c0_9], %19 {strides = array<i32>} : memref<128x128xf32, #tpu.memory_space<vmem>>, vector<128x128xf32>,
    return
  }
  func.func @transform_0(%arg0: i32, %arg1: i32) -> (i32, i32) {
    %c0_i32 = arith.constant 0 : i32
    %c0_i32_0 = arith.constant 0 : i32
    return %arg0, %c0_i32 : i32, i32
  }
  func.func @transform_1(%arg0: i32, %arg1: i32) -> (i32, i32) {
    %c0_i32 = arith.constant 0 : i32
    %c0_i32_0 = arith.constant 0 : i32
    return %arg1, %c0_i32 : i32, i32
  }
  func.func @transform_2(%arg0: i32, %arg1: i32) -> (i32, i32) {
    %c0_i32 = arith.constant 0 : i32
    return %arg0, %arg1 : i32, i32
  }
}

</mosaic_0001>

<bundles_post_ra>
// kernel: feature_similarity.1
= control target key start
LH: loop header
LB: loop body
LE: loop exit
PB: predicated region body
PF: predicated region fallthrough
CT: control target
= control target key end

     0   :  { %vm43_vm0 = vcmask 261120   ;;  %vm440_vm2 = vcmask 130112   ;;  %vm447_vm3 = vcmask 195712   ;;  %vm454_vm4 = vcmask 261312   ;;  %s1547_s1 = inlined_call_operand.vmem [shape: f32[128,32], index: 1, kind: input, shape index: {}, may-alias: {0,1}]   ;;  %s1548_s0 = inlined_call_operand.vmem [shape: f32[128,32], index: 0, kind: input, shape index: {}, may-alias: {0,1}]   ;;  %s1549_s2 = inlined_call_operand.vmem [shape: f32[128,128], index: 2, kind: output, shape index: {}]  }
   0x1   :  { %v27_v0 = vld [vmem:[%s1547_s1] sm:$0xff]  ;;  %v28_v1 = vld [vmem:[%s1547_s1 + $0x8] sm:$0xff]  ;;  %vm1004_vm1 = vmpackc.low %vm43_vm0, %vm43_vm0  ;;  %vm461_vm5 = vcmask 326912   ;;  %vm468_vm6 = vcmask 392512   ;;  %vm475_vm7 = vcmask 458112   ;;  %vm482_vm8 = vcmask 523712  }
   0x2   :  { %v885_v3 = vpack.c.bf16 %v28_v1, %v27_v0  ;;  %v29_v4 = vld [vmem:[%s1547_s1 + $0x10] sm:$0xff]  ;;  %v30_v5 = vld [vmem:[%s1547_s1 + $0x18] sm:$0xff]  ;;  %v349_v6 = vmul.f32 %v27_v0, %v27_v0  ;;  %v350_v11 = vmul.f32 %v28_v1, %v28_v1  ;;  %v1031_v13 = vld [vmem:[%s1548_s0] sm:$0xff]  ;;  %vm489_vm9 = vcmask 589312  }
   0x3   :  { %v891_v7 = vpack.c.bf16 %v30_v5, %v29_v4  ;;  %v351_v8 = vmul.f32 %v29_v4, %v29_v4  ;;  %v352_v10 = vmul.f32 %v30_v5, %v30_v5  ;;  %v31_v14 = vld [vmem:[%s1547_s1 + $0x20] sm:$0xff]  ;;  %v32_v15 = vld [vmem:[%s1547_s1 + $0x28] sm:$0xff]  ;;  %861 = vmatprep.mubr.msk.f32.mxu0 %vm43_vm0, %v1031_v13  ;;  %v33_v22 = vld [vmem:[%s1547_s1 + $0x30] sm:$0xff]  ;;  %v285_v55 = vmul.f32 %v1031_v13, %v1031_v13 }
   0x4   :  { %887 = vmatprep.subr.msk.bf16.mxu0 %vm1004_vm1, %v885_v3  ;;  %933 = vmatprep.subr.msk.bf16.mxu1 %vm1004_vm1, %v885_v3  ;;  %v365_v9 = vsel %vm43_vm0, %v349_v6, 0.0  ;;  %v1042_v16 = vld [vmem:[%s1548_s0 + $0x40] sm:$0xff]  ;;  %v368_v18 = vsel %vm43_vm0, %v350_v11, 0.0  ;;  %v354_v19 = vmul.f32 %v32_v15, %v32_v15  ;;  %v353_v20 = vmul.f32 %v31_v14, %v31_v14  ;;  %v34_v23 = vld [vmem:[%s1547_s1 + $0x38] sm:$0xff]  ;;  %v36_v29 = vld [vmem:[%s1547_s1 + $0x48] sm:$0xff] }
   0x5   :  { %890 = vmatpush3.bf16.xpose.msk.msra.mxu0 %vm1004_vm1, %v885_v3  ;;  %941 = vmatpush3.bf16.xpose.msk.msra.mxu1 %vm1004_vm1, %v885_v3  ;;  %v371_v12 = vsel %vm43_vm0, %v351_v8, 0.0  ;;  %v374_v17 = vsel %vm43_vm0, %v352_v10, 0.0  ;;  %v897_v21 = vpack.c.bf16 %v32_v15, %v31_v14  ;;  %v356_v26 = vmul.f32 %v34_v23, %v34_v23  ;;  %v35_v28 = vld [vmem:[%s1547_s1 + $0x40] sm:$0xff]  ;;  %v37_v35 = vld [vmem:[%s1547_s1 + $0x50] sm:$0xff]  ;;  %v38_v36 = vld [vmem:[%s1547_s1 + $0x58] sm:$0xff] }
   0x6   :  { %893 = vmatprep.subr.msk.bf16.mxu0 %vm1004_vm1, %v891_v7  ;;  %934 = vmatprep.subr.msk.bf16.mxu1 %vm1004_vm1, %v891_v7  ;;  %v380_v24 = vsel %vm43_vm0, %v354_v19, 0.0  ;;  %v377_v25 = vsel %vm43_vm0, %v353_v20, 0.0  ;;  %v355_v27 = vmul.f32 %v33_v22, %v33_v22  ;;  %v358_v32 = vmul.f32 %v36_v29, %v36_v29  ;;  %v39_v41 = vld [vmem:[%s1547_s1 + $0x60] sm:$0xff]  ;;  %v40_v42 = vld [vmem:[%s1547_s1 + $0x68] sm:$0xff]  ;;  %v41_v48 = vld [vmem:[%s1547_s1 + $0x70] sm:$0xff] }
   0x7   :  { %372 = vadd.xlane.f32.xlu1 %v371_v12  ;;  %366 = vadd.xlane.f32.xlu0 %v365_v9  ;;  %v386_v30 = vsel %vm43_vm0, %v356_v26, 0.0  ;;  %v357_v33 = vmul.f32 %v35_v28, %v35_v28  ;;  %v903_v34 = vpack.c.bf16 %v34_v23, %v33_v22  ;;  %v360_v39 = vmul.f32 %v38_v36, %v38_v36  ;;  %v42_v49 = vld [vmem:[%s1547_s1 + $0x78] sm:$0xff]  ;;  %v1117_v54 = vld [vmem:[%s1548_s0 + $0x8] sm:$0xff]  ;;  %v1128_v60 = vld [vmem:[%s1548_s0 + $0x10] sm:$0xff] }
   0x8   :  { %873 = vmatprep.mubr.msk.f32.mxu1 %vm43_vm0, %v1042_v16  ;;  %v383_v31 = vsel %vm43_vm0, %v355_v27, 0.0  ;;  %v392_v37 = vsel %vm43_vm0, %v358_v32, 0.0  ;;  %v359_v40 = vmul.f32 %v37_v35, %v37_v35  ;;  %v362_v45 = vmul.f32 %v40_v42, %v40_v42  ;;  %v1133_v61 = vld [vmem:[%s1548_s0 + $0x18] sm:$0xff]  ;;  %v1152_v3 = vld [vmem:[%s1548_s0 + $0x20] sm:$0xff]  ;;  %v1157_v4 = vld [vmem:[%s1548_s0 + $0x28] sm:$0xff] }
   0x9   :  { %v389_v38 = vsel %vm43_vm0, %v357_v33, 0.0  ;;  %v398_v43 = vsel %vm43_vm0, %v360_v39, 0.0  ;;  %v361_v46 = vmul.f32 %v39_v41, %v39_v41  ;;  %v909_v47 = vpack.c.bf16 %v36_v29, %v35_v28  ;;  %v1168_v10 = vld [vmem:[%s1548_s0 + $0x30] sm:$0xff]  ;;  %v1173_v11 = vld [vmem:[%s1548_s0 + $0x38] sm:$0xff]  ;;  %v23_v28 = vld [vmem:[%s1548_s0 + $0x60] sm:$0xff] }
   0xa   :  { %v395_v44 = vsel %vm43_vm0, %v359_v40, 0.0  ;;  %v404_v50 = vsel %vm43_vm0, %v362_v45, 0.0  ;;  %v364_v52 = vmul.f32 %v42_v49, %v42_v49  ;;  %v363_v53 = vmul.f32 %v41_v48, %v41_v48  ;;  %v21_v23 = vld [vmem:[%s1548_s0 + $0x50] sm:$0xff]  ;;  %v24_v29 = vld [vmem:[%s1548_s0 + $0x68] sm:$0xff] }
   0xb   :  { %375 = vadd.xlane.f32.xlu1 %v374_v17  ;;  %369 = vadd.xlane.f32.xlu0 %v368_v18  ;;  %v401_v51 = vsel %vm43_vm0, %v361_v46, 0.0  ;;  %v286_v58 = vmul.f32 %v1117_v54, %v1117_v54  ;;  %v915_v59 = vpack.c.bf16 %v38_v36, %v37_v35  ;;  %v301_v63 = vsel %vm43_vm0, %v285_v55, 0.0  ;;  %v20_v17 = vld [vmem:[%s1548_s0 + $0x48] sm:$0xff]  ;;  %v26_v35 = vld [vmem:[%s1548_s0 + $0x78] sm:$0xff] }
   0xc   :  { %v410_v56 = vsel %vm43_vm0, %v364_v52, 0.0  ;;  %v407_v57 = vsel %vm43_vm0, %v363_v53, 0.0  ;;  %v288_v0 = vmul.f32 %v1133_v61, %v1133_v61  ;;  %v287_v1 = vmul.f32 %v1128_v60, %v1128_v60 }
   0xd   :  { %896 = vmatpush3.bf16.xpose.msk.msra.mxu0 %vm1004_vm1, %v891_v7  ;;  %942 = vmatpush3.bf16.xpose.msk.msra.mxu1 %vm1004_vm1, %v891_v7  ;;  %v304_v62 = vsel %vm43_vm0, %v286_v58, 0.0  ;;  %v290_v7 = vmul.f32 %v1157_v4, %v1157_v4  ;;  %v289_v8 = vmul.f32 %v1152_v3, %v1152_v3  ;;  %v921_v9 = vpack.c.bf16 %v40_v42, %v39_v41 }
   0xe   :  { %899 = vmatprep.subr.msk.bf16.mxu0 %vm1004_vm1, %v897_v21  ;;  %935 = vmatprep.subr.msk.bf16.mxu1 %vm1004_vm1, %v897_v21  ;;  %v310_v5 = vsel %vm43_vm0, %v288_v0, 0.0  ;;  %v307_v6 = vsel %vm43_vm0, %v287_v1, 0.0  ;;  %v292_v14 = vmul.f32 %v1173_v11, %v1173_v11  ;;  %v291_v15 = vmul.f32 %v1168_v10, %v1168_v10 }
   0xf   :  { %381 = vadd.xlane.f32.xlu1 %v380_v24  ;;  %378 = vadd.xlane.f32.xlu0 %v377_v25  ;;  %v316_v12 = vsel %vm43_vm0, %v290_v7, 0.0  ;;  %v313_v13 = vsel %vm43_vm0, %v289_v8, 0.0  ;;  %v293_v18 = vmul.f32 %v1042_v16, %v1042_v16  ;;  %v927_v22 = vpack.c.bf16 %v42_v49, %v41_v48  ;;  %v22_v24 = vld [vmem:[%s1548_s0 + $0x58] sm:$0xff] }
  0x10   :  { %v322_v19 = vsel %vm43_vm0, %v292_v14, 0.0  ;;  %v319_v20 = vsel %vm43_vm0, %v291_v15, 0.0  ;;  %v296_v26 = vmul.f32 %v22_v24, %v22_v24  ;;  %v295_v27 = vmul.f32 %v21_v23, %v21_v23 }
  0x11   :  { %v325_v16 = vsel %vm43_vm0, %v293_v18, 0.0  ;;  %v298_v32 = vmul.f32 %v24_v29, %v24_v29  ;;  %v297_v33 = vmul.f32 %v23_v28, %v23_v28  ;;  %v429_v49 = vlaneseq }
  0x12   :  { %vm496_vm10 = vcmask 654912   ;;  %vm503_vm11 = vcmask 720512   ;;  %vm510_vm12 = vcmask 786112   ;;  %vm517_vm13 = vcmask 851712  }
  0x13   :  { %387 = vadd.xlane.f32.xlu1 %v386_v30  ;;  %384 = vadd.xlane.f32.xlu0 %v383_v31  ;;  %v334_v30 = vsel %vm43_vm0, %v296_v26, 0.0  ;;  %v331_v31 = vsel %vm43_vm0, %v295_v27, 0.0  ;;  %v340_v36 = vsel %vm43_vm0, %v298_v32, 0.0  ;;  %v1255_v52 = vand.u32 127, %v429_v49 }
  0x14   :  { %v1257_v53 = vshrl.u32 %v429_v49, 7  ;;  %vm524_vm14 = vcmask 917312   ;;  %vm531_vm15 = vcmask 982912  }
  0x15   :  { %902 = vmatpush3.bf16.xpose.msk.msra.mxu0 %vm1004_vm1, %v897_v21  ;;  %943 = vmatpush3.bf16.xpose.msk.msra.mxu1 %vm1004_vm1, %v897_v21  ;;  %v294_v21 = vmul.f32 %v20_v17, %v20_v17  ;;  %v463_v7 = vadd.s32 4294967256, %v1255_v52  ;;  %v477_v18 = vadd.s32 4294967240, %v1255_v52  ;;  %v491_v27 = vadd.s32 4294967224, %v1255_v52 }
  0x16   :  { %905 = vmatprep.subr.msk.bf16.mxu0 %vm1004_vm1, %v903_v34  ;;  %936 = vmatprep.subr.msk.bf16.mxu1 %vm1004_vm1, %v903_v34  ;;  %v433_v58 = vsub.s32 %v1255_v52, %v1257_v53 }
  0x17   :  { %393 = vadd.xlane.f32.xlu1 %v392_v37  ;;  %390 = vadd.xlane.f32.xlu0 %v389_v38  ;;  %v328_v25 = vsel %vm43_vm0, %v294_v21, 0.0  ;;  %v337_v37 = vsel %vm43_vm0, %v297_v33, 0.0  ;;  %v300_v38 = vmul.f32 %v26_v35, %v26_v35  ;;  %v466_v14 = vsub.s32 %v463_v7, %v1257_v53 }
  0x18   :  { %v498_v33 = vadd.s32 4294967216, %v1255_v52 }
  0x19   :  { %v346_v40 = vsel %vm43_vm0, %v300_v38, 0.0 }
  0x1a   :  { %v501_v38 = vsub.s32 %v498_v33, %v1257_v53 }
  0x1b   :  { %399 = vadd.xlane.f32.xlu1 %v398_v43  ;;  %396 = vadd.xlane.f32.xlu0 %v395_v44 }
  0x1d   :  { %908 = vmatpush3.bf16.xpose.msk.msra.mxu0 %vm1004_vm1, %v903_v34  ;;  %944 = vmatpush3.bf16.xpose.msk.msra.mxu1 %vm1004_vm1, %v903_v34  ;;  %v25_v34 = vld [vmem:[%s1548_s0 + $0x70] sm:$0xff] }
  0x1e   :  { %911 = vmatprep.subr.msk.bf16.mxu0 %vm1004_vm1, %v909_v47  ;;  %937 = vmatprep.subr.msk.bf16.mxu1 %vm1004_vm1, %v909_v47  ;;  %v299_v39 = vmul.f32 %v25_v34, %v25_v34 }
  0x1f   :  { %405 = vadd.xlane.f32.xlu1 %v404_v50  ;;  %402 = vadd.xlane.f32.xlu0 %v401_v51 }
  0x20   :  { %v343_v41 = vsel %vm43_vm0, %v299_v39, 0.0 }
  0x23   :  { %411 = vadd.xlane.f32.xlu1 %v410_v56  ;;  %408 = vadd.xlane.f32.xlu0 %v407_v57  ;;  %v442_v57 = vadd.s32 4294967280, %v1255_v52 }
  0x25   :  { %914 = vmatpush3.bf16.xpose.msk.msra.mxu0 %vm1004_vm1, %v909_v47  ;;  %945 = vmatpush3.bf16.xpose.msk.msra.mxu1 %vm1004_vm1, %v909_v47 }
  0x26   :  { %917 = vmatprep.subr.msk.bf16.mxu0 %vm1004_vm1, %v915_v59  ;;  %938 = vmatprep.subr.msk.bf16.mxu1 %vm1004_vm1, %v915_v59 }
  0x27   :  { %305 = vadd.xlane.f32.xlu1 %v304_v62  ;;  %302 = vadd.xlane.f32.xlu0 %v301_v63 }
  0x2b   :  { %311 = vadd.xlane.f32.xlu1 %v310_v5  ;;  %308 = vadd.xlane.f32.xlu0 %v307_v6 }
  0x2d   :  { %920 = vmatpush3.bf16.xpose.msk.msra.mxu0 %vm1004_vm1, %v915_v59  ;;  %946 = vmatpush3.bf16.xpose.msk.msra.mxu1 %vm1004_vm1, %v915_v59 }
  0x2e   :  { %923 = vmatprep.subr.msk.bf16.mxu0 %vm1004_vm1, %v921_v9  ;;  %939 = vmatprep.subr.msk.bf16.mxu1 %vm1004_vm1, %v921_v9 }
  0x2f   :  { %317 = vadd.xlane.f32.xlu1 %v316_v12  ;;  %314 = vadd.xlane.f32.xlu0 %v313_v13  ;;  %v470_v13 = vadd.s32 4294967248, %v1255_v52 }
  0x33   :  { %323 = vadd.xlane.f32.xlu1 %v322_v19  ;;  %320 = vadd.xlane.f32.xlu0 %v319_v20  ;;  %v473_v19 = vsub.s32 %v470_v13, %v1257_v53 }
  0x35   :  { %926 = vmatpush3.bf16.xpose.msk.msra.mxu0 %vm1004_vm1, %v921_v9  ;;  %947 = vmatpush3.bf16.xpose.msk.msra.mxu1 %vm1004_vm1, %v921_v9 }
  0x36   :  { %929 = vmatprep.subr.msk.bf16.mxu0 %vm1004_vm1, %v927_v22  ;;  %940 = vmatprep.subr.msk.bf16.mxu1 %vm1004_vm1, %v927_v22 }
  0x37   :  { %329 = vadd.xlane.f32.xlu1 %v328_v25  ;;  %326 = vadd.xlane.f32.xlu0 %v325_v16  ;;  %v480_v25 = vsub.s32 %v477_v18, %v1257_v53 }
  0x3b   :  { %335 = vadd.xlane.f32.xlu1 %v334_v30  ;;  %332 = vadd.xlane.f32.xlu0 %v331_v31 }
  0x3d   :  { %932 = vmatpush3.bf16.xpose.msk.msra.mxu0 %vm1004_vm1, %v927_v22  ;;  %948 = vmatpush3.bf16.xpose.msk.msra.mxu1 %vm1004_vm1, %v927_v22 }
  0x3f   :  { %341 = vadd.xlane.f32.xlu1 %v340_v36  ;;  %338 = vadd.xlane.f32.xlu0 %v337_v37  ;;  %v505_v37 = vadd.s32 4294967208, %v1255_v52 }
  0x43   :  { %347 = vadd.xlane.f32.xlu1 %v346_v40  ;;  %344 = vadd.xlane.f32.xlu0 %v343_v41 }
  0x44   :  { %862 = vmatmul.mubr.msk.f32.vlgmr.msra.gmra.mrb[0].mxu0 %vm43_vm0, %v1117_v54  ;;  %874 = vmatmul.mubr.msk.f32.vlgmr.msra.gmra.mrb[0].mxu1 %vm43_vm0, %v20_v17  ;;  %v435_v54 = vadd.s32 4294967288, %v1255_v52 }
  0x45   :  { %864 = vmatprep.mubr.msk.f32.mxu0 %vm43_vm0, %v1128_v60  ;;  %876 = vmatprep.mubr.msk.f32.mxu1 %vm43_vm0, %v21_v23  ;;  %v449_v60 = vadd.s32 4294967272, %v1255_v52 }
  0x46   :  { %v438_v59 = vsub.s32 %v435_v54, %v1257_v53  ;;  %v526_v54 = vadd.s32 4294967184, %v1255_v52 }
  0x48   :  { %865 = vmatmul.mubr.msk.f32.gmra.mrb[2].mxu0 %vm43_vm0, %v1133_v61  ;;  %877 = vmatmul.mubr.msk.f32.gmra.mrb[2].mxu1 %vm43_vm0, %v22_v24  ;;  %v445_v61 = vsub.s32 %v442_v57, %v1257_v53  ;;  %v484_v24 = vadd.s32 4294967232, %v1255_v52 }
  0x49   :  { %867 = vmatprep.mubr.msk.f32.mxu0 %vm43_vm0, %v1152_v3  ;;  %879 = vmatprep.mubr.msk.f32.mxu1 %vm43_vm0, %v23_v28  ;;  %v456_v3 = vadd.s32 4294967264, %v1255_v52 }
  0x4a   :  { %v487_v28 = vsub.s32 %v484_v24, %v1257_v53 }
  0x4b   :  { %v459_v8 = vsub.s32 %v456_v3, %v1257_v53 }
  0x4c   :  { %868 = vmatmul.mubr.msk.f32.gmra.mrb[4].mxu0 %vm43_vm0, %v1157_v4  ;;  %880 = vmatmul.mubr.msk.f32.gmra.mrb[4].mxu1 %vm43_vm0, %v24_v29  ;;  %v452_v4 = vsub.s32 %v449_v60, %v1257_v53  ;;  %v529_v60 = vsub.s32 %v526_v54, %v1257_v53 }
  0x4d   :  { %882 = vmatprep.mubr.msk.f32.mxu1 %vm43_vm0, %v25_v34  ;;  %870 = vmatprep.mubr.msk.f32.mxu0 %vm43_vm0, %v1168_v10  ;;  %v494_v34 = vsub.s32 %v491_v27, %v1257_v53 }
  0x50   :  { %871 = vmatmul.mubr.msk.f32.gmra.mrb[6].mxu0 %vm43_vm0, %v1173_v11  ;;  %883 = vmatmul.mubr.msk.f32.gmra.mrb[6].mxu1 %vm43_vm0, %v26_v35  ;;  %vm538_vm0 = vcmask 1048512  }
  0x94   :  { %v373_v2 = vpop.xlane.xlu1 %372  ;;  %v367_v42 = vpop.xlane.xlu0 %366 }
  0x95   :  { %v434_v0 = vrot.slane %v367_v42, %v433_v58  ;;  %v446_v5 = vrot.slane %v373_v2, %v445_v61  ;;  %v512_v42 = vadd.s32 4294967200, %v1255_v52 }
  0x98   :  { %v376_v43 = vpop.xlane.xlu1 %375  ;;  %v370_v44 = vpop.xlane.xlu0 %369 }
  0x99   :  { %v439_v1 = vrot.slane %v370_v44, %v438_v59  ;;  %v453_v11 = vrot.slane %v376_v43, %v452_v4  ;;  %v508_v43 = vsub.s32 %v505_v37, %v1257_v53  ;;  %v533_v59 = vadd.s32 4294967176, %v1255_v52 }
  0x9b   :  { %v441_v6 = vsel %vm440_vm2, %v439_v1, %v434_v0 }
  0x9c   :  { %v382_v45 = vpop.xlane.xlu1 %381  ;;  %v379_v46 = vpop.xlane.xlu0 %378  ;;  %v448_v12 = vsel %vm447_vm3, %v446_v5, %v441_v6 }
  0x9d   :  { %v460_v15 = vrot.slane %v379_v46, %v459_v8  ;;  %v455_v17 = vsel %vm454_vm4, %v453_v11, %v448_v12  ;;  %v467_v22 = vrot.slane %v382_v45, %v466_v14  ;;  %v519_v46 = vadd.s32 4294967192, %v1255_v52 }
  0x9f   :  { %v462_v23 = vsel %vm461_vm5, %v460_v15, %v455_v17  ;;  %v522_v57 = vsub.s32 %v519_v46, %v1257_v53 }
  0xa0   :  { %v388_v47 = vpop.xlane.xlu1 %387  ;;  %v385_v48 = vpop.xlane.xlu0 %384  ;;  %v469_v26 = vsel %vm468_vm6, %v467_v22, %v462_v23 }
  0xa1   :  { %v474_v16 = vrot.slane %v385_v48, %v473_v19  ;;  %v481_v31 = vrot.slane %v388_v47, %v480_v25  ;;  %v515_v47 = vsub.s32 %v512_v42, %v1257_v53 }
  0xa3   :  { %v476_v32 = vsel %vm475_vm7, %v474_v16, %v469_v26 }
  0xa4   :  { %v394_v50 = vpop.xlane.xlu1 %393  ;;  %v391_v51 = vpop.xlane.xlu0 %390  ;;  %v483_v36 = vsel %vm482_vm8, %v481_v31, %v476_v32 }
  0xa5   :  { %v488_v35 = vrot.slane %v391_v51, %v487_v28  ;;  %v495_v41 = vrot.slane %v394_v50, %v494_v34 }
  0xa7   :  { %v490_v2 = vsel %vm489_vm9, %v488_v35, %v483_v36 }
  0xa8   :  { %v1260_v55 = vpop.xlane.xlu1 %399  ;;  %v397_v56 = vpop.xlane.xlu0 %396  ;;  %v497_v45 = vsel %vm496_vm10, %v495_v41, %v490_v2 }
  0xa9   :  { %v502_v44 = vrot.slane %v397_v56, %v501_v38  ;;  %v509_v51 = vrot.slane %v1260_v55, %v508_v43  ;;  %v536_v55 = vsub.s32 %v533_v59, %v1257_v53 }
  0xab   :  { %v504_v50 = vsel %vm503_vm11, %v502_v44, %v497_v45 }
  0xac   :  { %v1268_v62 = vpop.xlane.xlu1 %405  ;;  %v1270_v63 = vpop.xlane.xlu0 %402  ;;  %v511_v58 = vsel %vm510_vm12, %v509_v51, %v504_v50 }
  0xad   :  { %v516_v56 = vrot.slane %v1270_v63, %v515_v47  ;;  %v523_v1 = vrot.slane %v1268_v62, %v522_v57 }
  0xaf   :  { %v518_v3 = vsel %vm517_vm13, %v516_v56, %v511_v58 }
  0xb0   :  { %v1276_v9 = vpop.xlane.xlu1 %411  ;;  %v1278_v10 = vpop.xlane.xlu0 %408  ;;  %v525_v5 = vsel %vm524_vm14, %v523_v1, %v518_v3 }
  0xb1   :  { %v530_v4 = vrot.slane %v1278_v10, %v529_v60  ;;  %v537_v7 = vrot.slane %v1276_v9, %v536_v55 }
  0xb3   :  { %v532_v52 = vsel %vm531_vm15, %v530_v4, %v525_v5 }
  0xb4   :  { %v1284_v20 = vpop.xlane.xlu1 %305  ;;  %v1286_v21 = vpop.xlane.xlu0 %302  ;;  %v539_v8 = vsel %vm538_vm0, %v537_v7, %v532_v52 }
  0xb5   :  { %v554_v62 = vadd.f32 %v539_v8, %v1284_v20  ;;  %v553_v19 = vadd.f32 %v539_v8, %v1286_v21 }
  0xb8   :  { %v1292_v29 = vpop.xlane.xlu1 %311  ;;  %v1294_v30 = vpop.xlane.xlu0 %308 }
  0xb9   :  { %v556_v31 = vadd.f32 %v539_v8, %v1292_v29  ;;  %v555_v20 = vadd.f32 %v539_v8, %v1294_v30 }
  0xbc   :  { %v1300_v39 = vpop.xlane.xlu1 %317  ;;  %v1302_v40 = vpop.xlane.xlu0 %314 }
  0xbd   :  { %v1331_v21 = vadd.f32 %v539_v8, %v1300_v39  ;;  %v1339_v43 = vadd.f32 %v539_v8, %v1302_v40 }
  0xc0   :  { %v1308_v48 = vpop.xlane.xlu1 %323  ;;  %v1310_v49 = vpop.xlane.xlu0 %320 }
  0xc1   :  { %v1342_v44 = vadd.f32 %v539_v8, %v1308_v48  ;;  %v1345_v39 = vadd.f32 %v539_v8, %v1310_v49 }
  0xc4   :  { %v330_v61 = vpop.xlane.xlu1 %329  ;;  %v327_v0 = vpop.xlane.xlu0 %326 }
  0xc5   :  { %v562_v15 = vadd.f32 %v539_v8, %v330_v61  ;;  %v561_v22 = vadd.f32 %v539_v8, %v327_v0 }
  0xc8   :  { %v336_v6 = vpop.xlane.xlu1 %335  ;;  %v333_v63 = vpop.xlane.xlu0 %332 }
  0xc9   :  { %v564_v47 = vadd.f32 %v539_v8, %v336_v6  ;;  %v563_v51 = vadd.f32 %v539_v8, %v333_v63 }
  0xcc   :  { %v342_v11 = vpop.xlane.xlu1 %341  ;;  %v339_v12 = vpop.xlane.xlu0 %338 }
  0xcd   :  { %v566_v50 = vadd.f32 %v539_v8, %v342_v11  ;;  %v1349_v56 = vadd.f32 %v539_v8, %v339_v12 }
  0xd0   :  { %v348_v41 = vpop.xlane.xlu1 %347  ;;  %v345_v2 = vpop.xlane.xlu0 %344 }
  0xd1   :  { %v1351_v40 = vadd.f32 %v539_v8, %v348_v41  ;;  %v1353_v48 = vadd.f32 %v539_v8, %v345_v2 }
 0x117   :  { %v863_v13 = vpop.f32.mrb[0].mxu0  ;;  %v875_v14 = vpop.f32.mrb[0].mxu1 }
 0x118   :  { %v570_v17 = vmul.f32 2.0, %v863_v13  ;;  %v578_v53 = vmul.f32 2.0, %v875_v14  ;;  %v206_v18 = vpop.f32.mrb[1].mxu0  ;;  %v246_v10 = vpop.f32.mrb[1].mxu1 }
 0x119   :  { %v569_v23 = vmul.f32 2.0, %v206_v18  ;;  %v577_v24 = vmul.f32 2.0, %v246_v10 }
 0x11a   :  { %v586_v9 = vsub.f32 %v554_v62, %v570_v17  ;;  %v594_v25 = vsub.f32 %v562_v15, %v578_v53 }
 0x11b   :  { %v585_v16 = vsub.f32 %v553_v19, %v569_v23  ;;  %v593_v26 = vsub.f32 %v561_v22, %v577_v24  ;;  %v866_v27 = vpop.f32.mrb[2].mxu0  ;;  %v878_v28 = vpop.f32.mrb[2].mxu1 }
 0x11c   :  { %v1326_v32 = vmax.f32 %v586_v9, 0.0  ;;  %v1328_v33 = vmax.f32 %v594_v25, 0.0  ;;  %v216_v34 = vpop.f32.mrb[3].mxu0  ;;  %v256_v35 = vpop.f32.mrb[3].mxu1  ;;  %v572_v38 = vmul.f32 2.0, %v866_v27  ;;  %v580_v29 = vmul.f32 2.0, %v878_v28 }
 0x11d   :  { %v1333_v36 = vmax.f32 %v585_v16, 0.0  ;;  %v1335_v37 = vmax.f32 %v593_v26, 0.0  ;;  %v571_v30 = vmul.f32 2.0, %v216_v34  ;;  %v579_v42 = vmul.f32 2.0, %v256_v35 }
 0x11e   :  { %949 = vrsqrt.f32 %v1326_v32  ;;  %vm626_vm1 = vcmp.eq.f32.partialorder %v1326_v32, inf  ;;  %v588_v49 = vsub.f32 %v556_v31, %v572_v38  ;;  %v596_v58 = vsub.f32 %v564_v47, %v580_v29 }
 0x11f   :  { %951 = vrsqrt.f32 %v1328_v33  ;;  %v869_v45 = vpop.f32.mrb[4].mxu0  ;;  %v881_v46 = vpop.f32.mrb[4].mxu1  ;;  %v587_v59 = vsub.f32 %v555_v20, %v571_v30  ;;  %v595_v60 = vsub.f32 %v563_v51, %v579_v42  ;;  %vm628_vm2 = vcmp.eq.f32.partialorder %v1326_v32, 0.0 }
 0x120   :  { %953 = vrsqrt.f32 %v1333_v36  ;;  %v226_v54 = vpop.f32.mrb[5].mxu0  ;;  %v266_v57 = vpop.f32.mrb[5].mxu1  ;;  %v629_v61 = vand.u32 2147483648, %v1326_v32  ;;  %v574_v0 = vmul.f32 2.0, %v869_v45  ;;  %v582_v1 = vmul.f32 2.0, %v881_v46 }
 0x121   :  { %955 = vrsqrt.f32 %v1335_v37  ;;  %vm682_vm3 = vcmp.eq.f32.partialorder %v1328_v33, inf  ;;  %v1364_v4 = vmax.f32 %v588_v49, 0.0  ;;  %v1366_v5 = vmax.f32 %v596_v58, 0.0 }
 0x122   :  { %v1368_v6 = vmax.f32 %v587_v59, 0.0  ;;  %vm684_vm4 = vcmp.eq.f32.partialorder %v1328_v33, 0.0  ;;  %v1375_v52 = vmax.f32 %v595_v60, 0.0  ;;  %v573_v8 = vmul.f32 2.0, %v226_v54 }
 0x123   :  { %v1359_v3 = vpop.f32.mrb[6].mxu0  ;;  %v1361_v55 = vpop.f32.mrb[6].mxu1  ;;  %v581_v11 = vmul.f32 2.0, %v266_v57  ;;  %v685_v12 = vand.u32 2147483648, %v1328_v33  ;;  %vm619_vm5 = vcmp.eq.f32.partialorder %v1333_v36, inf  ;;  %957 = vrsqrt.f32 %v1364_v4 }
 0x124   :  { %v1370_v63 = vpop.f32.mrb[7].mxu0  ;;  %v1372_v7 = vpop.f32.mrb[7].mxu1  ;;  %v590_v13 = vsub.f32 %v1331_v21, %v574_v0  ;;  %vm621_vm6 = vcmp.eq.f32.partialorder %v1333_v36, 0.0  ;;  %v622_v14 = vand.u32 2147483648, %v1333_v36  ;;  %959 = vrsqrt.f32 %v1366_v5 }
 0x125   :  { %v598_v62 = vsub.f32 %v566_v50, %v582_v1  ;;  %vm675_vm7 = vcmp.eq.f32.partialorder %v1335_v37, inf  ;;  %vm677_vm8 = vcmp.eq.f32.partialorder %v1335_v37, 0.0  ;;  %v678_v17 = vand.u32 2147483648, %v1335_v37 }
 0x126   :  { %961 = vrsqrt.f32 %v1368_v6  ;;  %v589_v10 = vsub.f32 %v1339_v43, %v573_v8  ;;  %v597_v19 = vsub.f32 %v1349_v56, %v581_v11  ;;  %vm640_vm9 = vcmp.eq.f32.partialorder %v1364_v4, inf }
 0x127   :  { %963 = vrsqrt.f32 %v1375_v52  ;;  %v643_v24 = vand.u32 2147483648, %v1364_v4  ;;  %v1395_v9 = vmax.f32 %v590_v13, 0.0  ;;  %vm642_vm10 = vcmp.eq.f32.partialorder %v1364_v4, 0.0 }
 0x128   :  { %v950_v15 = vpop.eup %949  ;;  %vm696_vm11 = vcmp.eq.f32.partialorder %v1366_v5, inf  ;;  %v1403_v27 = vmax.f32 %v598_v62, 0.0  ;;  %v1417_v38 = vmax.f32 %v589_v10, 0.0  ;;  %v1424_v29 = vmax.f32 %v597_v19, 0.0 }
 0x129   :  { %v952_v53 = vpop.eup %951  ;;  %v625_v18 = vmul.f32 %v950_v15, %v1326_v32  ;;  %965 = vrsqrt.f32 %v1395_v9  ;;  %vm698_vm12 = vcmp.eq.f32.partialorder %v1366_v5, 0.0  ;;  %v699_v43 = vand.u32 2147483648, %v1366_v5 }
 0x12a   :  { %v954_v22 = vpop.eup %953  ;;  %v681_v23 = vmul.f32 %v952_v53, %v1328_v33  ;;  %967 = vrsqrt.f32 %v1403_v27  ;;  %vm633_vm13 = vcmp.eq.f32.partialorder %v1368_v6, inf  ;;  %vm635_vm14 = vcmp.eq.f32.partialorder %v1368_v6, 0.0 }
 0x12b   :  { %v956_v25 = vpop.eup %955  ;;  %v627_v16 = vsel %vm626_vm1, %v1326_v32, %v625_v18  ;;  %v618_v26 = vmul.f32 %v954_v22, %v1333_v36  ;;  %v636_v46 = vand.u32 2147483648, %v1368_v6  ;;  %vm689_vm15 = vcmp.eq.f32.partialorder %v1375_v52, inf }
 0x12c   :  { %v630_v28 = vsel %vm628_vm2, %v629_v61, %v627_v16  ;;  %v683_v31 = vsel %vm682_vm3, %v1328_v33, %v681_v23  ;;  %v674_v20 = vmul.f32 %v956_v25, %v1335_v37  ;;  %969 = vrsqrt.f32 %v1417_v38 }
 0x12d   :  { %v730_v34 = vsub.f32 0.0, %v630_v28  ;;  %v686_v35 = vsel %vm684_vm4, %v685_v12, %v683_v31  ;;  %v620_v21 = vsel %vm619_vm5, %v1333_v36, %v618_v26  ;;  %v958_v36 = vpop.eup %957  ;;  %vm691_vm0 = vcmp.eq.f32.partialorder %v1375_v52, 0.0 }
 0x12e   :  { %v738_v32 = vsub.f32 0.0, %v686_v35  ;;  %v623_v41 = vsel %vm621_vm6, %v622_v14, %v620_v21  ;;  %v676_v2 = vsel %vm675_vm7, %v1335_v37, %v674_v20  ;;  %v960_v45 = vpop.eup %959  ;;  %v639_v37 = vmul.f32 %v958_v36, %v1364_v4 }
 0x12f   :  { %746 = vst [vmem:[%s1549_s2 + $0x8] sm:$0xff] %v730_v34  ;;  %v729_v33 = vsub.f32 0.0, %v623_v41  ;;  %v679_v30 = vsel %vm677_vm8, %v678_v17, %v676_v2  ;;  %v695_v51 = vmul.f32 %v960_v45, %v1366_v5  ;;  %v692_v50 = vand.u32 2147483648, %v1375_v52 }
 0x130   :  { %754 = vst [vmem:[%s1549_s2 + $0x48] sm:$0xff] %v738_v32  ;;  %v737_v42 = vsub.f32 0.0, %v679_v30  ;;  %v962_v47 = vpop.eup %961  ;;  %971 = vrsqrt.f32 %v1424_v29  ;;  %v641_v57 = vsel %vm640_vm9, %v1364_v4, %v639_v37  ;;  %vm654_vm1 = vcmp.eq.f32.partialorder %v1395_v9, inf }
 0x131   :  { %745 = vst [vmem:[%s1549_s2] sm:$0xff] %v729_v33  ;;  %v964_v54 = vpop.eup %963  ;;  %v632_v56 = vmul.f32 %v962_v47, %v1368_v6  ;;  %vm656_vm2 = vcmp.eq.f32.partialorder %v1395_v9, 0.0  ;;  %v644_v49 = vsel %vm642_vm10, %v643_v24, %v641_v57  ;;  %v697_v58 = vsel %vm696_vm11, %v1366_v5, %v695_v51 }
 0x132   :  { %753 = vst [vmem:[%s1549_s2 + $0x40] sm:$0xff] %v737_v42  ;;  %v688_v59 = vmul.f32 %v964_v54, %v1375_v52  ;;  %v576_v60 = vmul.f32 2.0, %v1359_v3  ;;  %v732_v61 = vsub.f32 0.0, %v644_v49  ;;  %v700_v0 = vsel %vm698_vm12, %v699_v43, %v697_v58 }
 0x133   :  { %v634_v1 = vsel %vm633_vm13, %v1368_v6, %v632_v56  ;;  %v584_v8 = vmul.f32 2.0, %v1361_v55  ;;  %v966_v4 = vpop.eup %965  ;;  %v740_v11 = vsub.f32 0.0, %v700_v0  ;;  %v657_v15 = vand.u32 2147483648, %v1395_v9 }
 0x134   :  { %v637_v12 = vsel %vm635_vm14, %v636_v46, %v634_v1  ;;  %v690_v13 = vsel %vm689_vm15, %v1375_v52, %v688_v59  ;;  %v592_v3 = vsub.f32 %v1342_v44, %v576_v60  ;;  %748 = vst [vmem:[%s1549_s2 + $0x18] sm:$0xff] %v732_v61  ;;  %v653_v55 = vmul.f32 %v966_v4, %v1395_v9  ;;  %v968_v17 = vpop.eup %967 }
 0x135   :  { %v731_v5 = vsub.f32 0.0, %v637_v12  ;;  %v693_v14 = vsel %vm691_vm0, %v692_v50, %v690_v13  ;;  %v600_v62 = vsub.f32 %v1351_v40, %v584_v8  ;;  %756 = vst [vmem:[%s1549_s2 + $0x58] sm:$0xff] %v740_v11  ;;  %vm710_vm3 = vcmp.eq.f32.partialorder %v1403_v27, inf }
 0x136   :  { %v739_v6 = vsub.f32 0.0, %v693_v14  ;;  %v608_v44 = vmax.f32 %v592_v3, 0.0  ;;  %v655_v52 = vsel %vm654_vm1, %v1395_v9, %v653_v55  ;;  %vm712_vm4 = vcmp.eq.f32.partialorder %v1403_v27, 0.0  ;;  %v970_v22 = vpop.eup %969 }
 0x137   :  { %747 = vst [vmem:[%s1549_s2 + $0x10] sm:$0xff] %v731_v5  ;;  %v616_v40 = vmax.f32 %v600_v62, 0.0  ;;  %v575_v53 = vmul.f32 2.0, %v1370_v63  ;;  %v658_v18 = vsel %vm656_vm2, %v657_v15, %v655_v52  ;;  %v709_v10 = vmul.f32 %v968_v17, %v1403_v27 }
 0x138   :  { %755 = vst [vmem:[%s1549_s2 + $0x50] sm:$0xff] %v739_v6  ;;  %973 = vrsqrt.f32 %v608_v44  ;;  %v583_v19 = vmul.f32 2.0, %v1372_v7  ;;  %v734_v23 = vsub.f32 0.0, %v658_v18  ;;  %v713_v24 = vand.u32 2147483648, %v1403_v27 }
 0x139   :  { %vm647_vm5 = vcmp.eq.f32.partialorder %v1417_v38, inf  ;;  %975 = vrsqrt.f32 %v616_v40  ;;  %v711_v25 = vsel %vm710_vm3, %v1403_v27, %v709_v10  ;;  %v646_v9 = vmul.f32 %v970_v22, %v1417_v38 }
 0x13a   :  { %v972_v63 = vpop.eup %971  ;;  %vm649_vm6 = vcmp.eq.f32.partialorder %v1417_v38, 0.0  ;;  %v650_v16 = vand.u32 2147483648, %v1417_v38  ;;  %750 = vst [vmem:[%s1549_s2 + $0x28] sm:$0xff] %v734_v23  ;;  %v714_v7 = vsel %vm712_vm4, %v713_v24, %v711_v25  ;;  %vm703_vm7 = vcmp.eq.f32.partialorder %v1424_v29, inf }
 0x13b   :  { %v702_v26 = vmul.f32 %v972_v63, %v1424_v29  ;;  %v591_v28 = vsub.f32 %v1345_v39, %v575_v53  ;;  %v742_v31 = vsub.f32 0.0, %v714_v7  ;;  %v648_v20 = vsel %vm647_vm5, %v1417_v38, %v646_v9 }
 0x13c   :  { %v706_v34 = vand.u32 2147483648, %v1424_v29  ;;  %v599_v35 = vsub.f32 %v1353_v48, %v583_v19  ;;  %v651_v21 = vsel %vm649_vm6, %v650_v16, %v648_v20  ;;  %vm705_vm8 = vcmp.eq.f32.partialorder %v1424_v29, 0.0 }
 0x13d   :  { %v704_v32 = vsel %vm703_vm7, %v1424_v29, %v702_v26  ;;  %v607_v27 = vmax.f32 %v591_v28, 0.0  ;;  %758 = vst [vmem:[%s1549_s2 + $0x68] sm:$0xff] %v742_v31  ;;  %v733_v41 = vsub.f32 0.0, %v651_v21  ;;  %vm668_vm9 = vcmp.eq.f32.partialorder %v608_v44, inf }
 0x13e   :  { %v707_v2 = vsel %vm705_vm8, %v706_v34, %v704_v32  ;;  %v615_v39 = vmax.f32 %v599_v35, 0.0  ;;  %v671_v30 = vand.u32 2147483648, %v608_v44  ;;  %vm670_vm10 = vcmp.eq.f32.partialorder %v608_v44, 0.0 }
 0x13f   :  { %v741_v33 = vsub.f32 0.0, %v707_v2  ;;  %977 = vrsqrt.f32 %v607_v27  ;;  %749 = vst [vmem:[%s1549_s2 + $0x20] sm:$0xff] %v733_v41  ;;  %vm724_vm11 = vcmp.eq.f32.partialorder %v616_v40, inf  ;;  %v727_v43 = vand.u32 2147483648, %v616_v40 }
 0x140   :  { %979 = vrsqrt.f32 %v615_v39  ;;  %vm726_vm12 = vcmp.eq.f32.partialorder %v616_v40, 0.0  ;;  %vm661_vm13 = vcmp.eq.f32.partialorder %v607_v27, inf  ;;  %v664_v56 = vand.u32 2147483648, %v607_v27 }
 0x141   :  { %757 = vst [vmem:[%s1549_s2 + $0x60] sm:$0xff] %v741_v33  ;;  %vm663_vm14 = vcmp.eq.f32.partialorder %v607_v27, 0.0  ;;  %vm717_vm15 = vcmp.eq.f32.partialorder %v615_v39, inf  ;;  %v720_v59 = vand.u32 2147483648, %v615_v39  ;;  %vm719_vm0 = vcmp.eq.f32.partialorder %v615_v39, 0.0 }
 0x142   :  { %v974_v48 = vpop.eup %973 }
 0x143   :  { %v976_v38 = vpop.eup %975  ;;  %v667_v29 = vmul.f32 %v974_v48, %v608_v44 }
 0x144   :  { %v723_v36 = vmul.f32 %v976_v38, %v616_v40 }
 0x145   :  { %v669_v42 = vsel %vm668_vm9, %v608_v44, %v667_v29 }
 0x146   :  { %v672_v45 = vsel %vm670_vm10, %v671_v30, %v669_v42  ;;  %v725_v37 = vsel %vm724_vm11, %v616_v40, %v723_v36 }
 0x147   :  { %v736_v46 = vsub.f32 0.0, %v672_v45  ;;  %v728_v47 = vsel %vm726_vm12, %v727_v43, %v725_v37 }
 0x148   :  { %v744_v51 = vsub.f32 0.0, %v728_v47 }
 0x149   :  { %v978_v50 = vpop.eup %977  ;;  %752 = vst [vmem:[%s1549_s2 + $0x38] sm:$0xff] %v736_v46 }
 0x14a   :  { %v980_v54 = vpop.eup %979  ;;  %760 = vst [vmem:[%s1549_s2 + $0x78] sm:$0xff] %v744_v51  ;;  %v660_v57 = vmul.f32 %v978_v50, %v607_v27 }
 0x14b   :  { %v716_v49 = vmul.f32 %v980_v54, %v615_v39 }
 0x14c   :  { %v662_v58 = vsel %vm661_vm13, %v607_v27, %v660_v57 }
 0x14d   :  { %v665_v60 = vsel %vm663_vm14, %v664_v56, %v662_v58  ;;  %v718_v61 = vsel %vm717_vm15, %v615_v39, %v716_v49 }
 0x14e   :  { %v735_v0 = vsub.f32 0.0, %v665_v60  ;;  %v721_v1 = vsel %vm719_vm0, %v720_v59, %v718_v61 }
 0x14f   :  { %v743_v8 = vsub.f32 0.0, %v721_v1 }
 0x150   :  { %751 = vst [vmem:[%s1549_s2 + $0x30] sm:$0xff] %v735_v0 }
 0x151   :  { %759 = vst [vmem:[%s1549_s2 + $0x70] sm:$0xff] %v743_v8 }

</bundles_post_ra>
